<compile_context>
chip_gen: v7x
topology: tpu7x:2x2x1
jax: 0.10.0
libtpu: 0.0.40
codegen_flags: <defaults>
</compile_context>

<pallas_src>
import functools

import jax
import jax.numpy as jnp
from jax.experimental import pallas as pl
from jax.experimental.pallas import tpu as pltpu

LN_EPS = 1e-5  # PyTorch nn.LayerNorm default


# ---------------------------------------------------------------------------
# hardware-aware sizing helpers
# ---------------------------------------------------------------------------
@functools.lru_cache(maxsize=None)
def _vmem_limit_bytes():
    """~80% of physical VMEM: ~51 MiB on v7x, ~102 MiB on v5e/v6e."""
    try:
        cap = int(pltpu.get_tpu_info().vmem_capacity_bytes)
    except Exception:
        cap = 64 * 1024 * 1024  # conservative fallback (safe on every gen)
    return max(32 << 20, int(cap * 0.8))


def _seq_tile_prefs():
    # >=256 rows fill the 256-wide MXU on v6e/v7x and amortize per-grid-step
    # overhead; on the smaller-VMEM part keep the list more conservative.
    return (256, 128) if _vmem_limit_bytes() < (72 << 20) else (512, 256, 128)


def _pick_tile(n, prefs):
    """Largest preferred tile that divides n, else the full dimension."""
    for p in prefs:
        if n % p == 0:
            return p
    return n
    # TODO(synk): pad + mask non-divisible long sequences instead of falling
    # back to a full-dimension block.


@functools.lru_cache(maxsize=None)
def _buffered1_ok():
    """Probe (compile+run a tiny kernel) whether pl.Buffered(1) is usable."""
    try:
        spec = pl.BlockSpec((8, 128), lambda i: (0, 0),
                            pipeline_mode=pl.Buffered(1))

        def k(a_ref, o_ref):
            o_ref[...] = a_ref[...] * 2.0

        out = pl.pallas_call(
            k,
            out_shape=jax.ShapeDtypeStruct((16, 128), jnp.float32),
            grid=(2,),
            in_specs=[spec],
            out_specs=pl.BlockSpec((8, 128), lambda i: (i, 0)),
        )(jnp.ones((8, 128), jnp.float32))
        jax.block_until_ready(out)
        return True
    except Exception:
        return False


def _const_spec(shape):
    """Whole-array block, same block every grid step (weights / LN params).

    Single-buffered when supported: the block is only fetched once, so the
    default double-buffer would just waste VMEM.
    """
    nd = len(shape)
    idx = lambda *_: (0,) * nd
    if _buffered1_ok():
        return pl.BlockSpec(shape, idx, pipeline_mode=pl.Buffered(1))
    return pl.BlockSpec(shape, idx)


def _cparams(semantics):
    return pltpu.CompilerParams(dimension_semantics=semantics,
                                vmem_limit_bytes=_vmem_limit_bytes())


# ---------------------------------------------------------------------------
# in-kernel math helpers
# ---------------------------------------------------------------------------
def _layer_norm(x, gamma, beta):
    """f32 LayerNorm over the last axis (VPU/EUP math kept in f32)."""
    mu = jnp.mean(x, axis=-1, keepdims=True)
    var = jnp.mean((x - mu) ** 2, axis=-1, keepdims=True)
    return (x - mu) * jax.lax.rsqrt(var + LN_EPS) * gamma + beta


# ---------------------------------------------------------------------------
# Pallas kernels
# ---------------------------------------------------------------------------
def _kv_kernel(x_ref, ln1g_ref, ln1b_ref, wkv_ref, bkv_ref, k_ref, v_ref):
    """LN1 + fused K/V projection for one (tq, C) row tile of one batch elem."""
    x = x_ref[...].astype(jnp.float32)                       # (tq, C)
    C = x.shape[-1]
    xn = _layer_norm(x, ln1g_ref[...], ln1b_ref[...])
    kv = jnp.dot(xn.astype(jnp.bfloat16), wkv_ref[...],
                 preferred_element_type=jnp.float32) + bkv_ref[...]
    k_ref[...] = kv[:, :C].astype(jnp.bfloat16)
    v_ref[...] = kv[:, C:].astype(jnp.bfloat16)


def _attn_kernel(x_ref, k_ref, v_ref, ln1g_ref, ln1b_ref, wq_ref, bq_ref,
                 y_ref, q_sc, m_sc, l_sc, acc_sc, *, n_head):
    """LN1 + Q projection + flash-style attention + residual for one q tile.

    Grid: (B, nq, nkv) with the K/V-tile axis "arbitrary" (online softmax).
    """
    kv_i = pl.program_id(2)
    n_kv = pl.num_programs(2)
    tq, C = x_ref.shape
    hd = C // n_head
    scale = 1.0 / (hd ** 0.5)

    @pl.when(kv_i == 0)
    def _():
        x = x_ref[...].astype(jnp.float32)
        xn = _layer_norm(x, ln1g_ref[...], ln1b_ref[...])
        q = jnp.dot(xn.astype(jnp.bfloat16), wq_ref[...],
                    preferred_element_type=jnp.float32) + bq_ref[...]
        q_sc[...] = (q * scale).astype(jnp.bfloat16)   # fold 1/sqrt(hd) once
        m_sc[...] = jnp.full(m_sc.shape, -jnp.inf, dtype=jnp.float32)
        l_sc[...] = jnp.zeros(l_sc.shape, dtype=jnp.float32)
        acc_sc[...] = jnp.zeros(acc_sc.shape, dtype=jnp.float32)

    tk = k_ref.shape[0]
    q = q_sc[...].reshape(tq, n_head, hd)                    # bf16
    k = k_ref[...].reshape(tk, n_head, hd)
    v = v_ref[...].reshape(tk, n_head, hd)

    # Scores for all heads at once (MXU, f32 accumulate); q already scaled.
    s = jnp.einsum('qhd,khd->hqk', q, k,
                   preferred_element_type=jnp.float32)       # (H, tq, tk)

    # Online softmax update (f32).
    m_prev = m_sc[...]
    m_new = jnp.maximum(m_prev, s.max(axis=-1, keepdims=True))
    alpha = jnp.exp(m_prev - m_new)
    p = jnp.exp(s - m_new)
    l_sc[...] = alpha * l_sc[...] + p.sum(axis=-1, keepdims=True)
    acc_sc[...] = alpha * acc_sc[...] + jnp.einsum(
        'hqk,khd->hqd', p.astype(jnp.bfloat16), v,
        preferred_element_type=jnp.float32)
    m_sc[...] = m_new

    @pl.when(kv_i == n_kv - 1)
    def _():
        # Exact division (not approx reciprocal) to track the f32 reference.
        out = acc_sc[...] / l_sc[...]                        # (H, tq, hd)
        out = jnp.swapaxes(out, 0, 1).reshape(tq, C)         # (tq, C)
        y_ref[...] = (x_ref[...].astype(jnp.float32) + out).astype(jnp.bfloat16)
    # TODO(synk): train-mode attention dropout (PRNG-based) omitted; matches eval().


def _mlp_kernel(y_ref, ln2g_ref, ln2b_ref, w1_ref, b1_ref, w2_ref, b2_ref,
                o_ref, xn_sc, acc_sc):
    """LN2 + MLP (hidden dim streamed in chunks) + residual for one row tile.

    Grid: (B, nq, nh) with the hidden-chunk axis "arbitrary".
    """
    h_i = pl.program_id(2)
    n_h = pl.num_programs(2)

    @pl.when(h_i == 0)
    def _():
        y = y_ref[...].astype(jnp.float32)
        xn_sc[...] = _layer_norm(y, ln2g_ref[...],
                                 ln2b_ref[...]).astype(jnp.bfloat16)
        acc_sc[...] = y + b2_ref[...]          # residual + fc2 bias, added once

    h1 = jnp.dot(xn_sc[...], w1_ref[...],
                 preferred_element_type=jnp.float32) + b1_ref[...]
    h1 = jnp.maximum(h1, 0.0)                  # ReLU (f32)
    acc_sc[...] = acc_sc[...] + jnp.dot(h1.astype(jnp.bfloat16), w2_ref[...],
                                        preferred_element_type=jnp.float32)

    @pl.when(h_i == n_h - 1)
    def _():
        o_ref[...] = acc_sc[...].astype(jnp.bfloat16)
    # TODO(synk): train-mode MLP dropout omitted; forward matches model.eval().


def _final_ln_kernel(x_ref, lng_ref, lnb_ref, o_ref):
    """Final LayerNorm, computed once per row tile (not per vocab tile)."""
    x = x_ref[...].astype(jnp.float32)
    o_ref[...] = _layer_norm(x, lng_ref[...], lnb_ref[...]).astype(jnp.bfloat16)


def _decoder_kernel(xn_ref, wdec_ref, bdec_ref, o_ref):
    """Decoder Linear for one (row-tile, vocab-tile) output block."""
    o_ref[...] = jnp.dot(xn_ref[...], wdec_ref[...],
                         preferred_element_type=jnp.float32) + bdec_ref[...]


# ---------------------------------------------------------------------------
# Wrappers (pallas_call plumbing)
# ---------------------------------------------------------------------------
def block_forward(x, p, n_head):
    """x: (B, T, C) bf16 -> (B, T, C) bf16 (one transformer Block)."""
    B, T, C = x.shape
    assert C % n_head == 0
    tq = _pick_tile(T, _seq_tile_prefs())
    nq = T // tq
    tk = _pick_tile(T, (512, 256, 128))
    nkv = T // tk
    H = p["w1"].shape[1]
    th = _pick_tile(H, (2048, 1024, 512))
    nh = H // th

    # ---- stage 1: LN1 + K/V projection, tiled over T ----
    k, v = pl.pallas_call(
        _kv_kernel,
        out_shape=(jax.ShapeDtypeStruct((B, T, C), jnp.bfloat16),) * 2,
        grid=(B, nq),
        in_specs=[
            pl.BlockSpec((None, tq, C), lambda b, i: (b, i, 0)),
            _const_spec(p["ln1_g"].shape), _const_spec(p["ln1_b"].shape),
            _const_spec(p["w_kv"].shape), _const_spec(p["b_kv"].shape),
        ],
        out_specs=(pl.BlockSpec((None, tq, C), lambda b, i: (b, i, 0)),) * 2,
        compiler_params=_cparams(("parallel", "parallel")),
    )(x, p["ln1_g"], p["ln1_b"], p["w_kv"], p["b_kv"])

    # ---- stage 2: LN1 + Q projection + flash attention + residual ----
    y = pl.pallas_call(
        functools.partial(_attn_kernel, n_head=n_head),
        out_shape=jax.ShapeDtypeStruct((B, T, C), jnp.bfloat16),
        grid=(B, nq, nkv),
        in_specs=[
            pl.BlockSpec((None, tq, C), lambda b, i, j: (b, i, 0)),   # x tile
            pl.BlockSpec((None, tk, C), lambda b, i, j: (b, j, 0)),   # K tile
            pl.BlockSpec((None, tk, C), lambda b, i, j: (b, j, 0)),   # V tile
            _const_spec(p["ln1_g"].shape), _const_spec(p["ln1_b"].shape),
            _const_spec(p["w_q"].shape), _const_spec(p["b_q"].shape),
        ],
        out_specs=pl.BlockSpec((None, tq, C), lambda b, i, j: (b, i, 0)),
        scratch_shapes=[
            pltpu.VMEM((tq, C), jnp.bfloat16),                    # scaled q
            pltpu.VMEM((n_head, tq, 1), jnp.float32),             # m
            pltpu.VMEM((n_head, tq, 1), jnp.float32),             # l
            pltpu.VMEM((n_head, tq, C // n_head), jnp.float32),   # acc
        ],
        compiler_params=_cparams(("parallel", "parallel", "arbitrary")),
    )(x, k, v, p["ln1_g"], p["ln1_b"], p["w_q"], p["b_q"])

    # ---- stage 3: LN2 + MLP (hidden dim streamed) + residual ----
    return pl.pallas_call(
        _mlp_kernel,
        out_shape=jax.ShapeDtypeStruct((B, T, C), jnp.bfloat16),
        grid=(B, nq, nh),
        in_specs=[
            pl.BlockSpec((None, tq, C), lambda b, i, h: (b, i, 0)),   # y tile
            _const_spec(p["ln2_g"].shape), _const_spec(p["ln2_b"].shape),
            pl.BlockSpec((C, th), lambda b, i, h: (0, h)),            # w1 chunk
            pl.BlockSpec((1, th), lambda b, i, h: (0, h)),            # b1 chunk
            pl.BlockSpec((th, C), lambda b, i, h: (h, 0)),            # w2 chunk
            _const_spec(p["b2"].shape),
        ],
        out_specs=pl.BlockSpec((None, tq, C), lambda b, i, h: (b, i, 0)),
        scratch_shapes=[
            pltpu.VMEM((tq, C), jnp.bfloat16),     # LN2(y)
            pltpu.VMEM((tq, C), jnp.float32),      # accumulator
        ],
        compiler_params=_cparams(("parallel", "parallel", "arbitrary")),
    )(y, p["ln2_g"], p["ln2_b"], p["w1"], p["b1"], p["w2"], p["b2"])


def head_forward(x, p):
    """x: (B, T, C) bf16 -> logits (B, T, V) f32. LN once, decoder T/V tiled."""
    B, T, C = x.shape
    tt = _pick_tile(T, _seq_tile_prefs())
    nt = T // tt

    # Final LN, computed once per row tile (hoisted out of the vocab loop).
    xn = pl.pallas_call(
        _final_ln_kernel,
        out_shape=jax.ShapeDtypeStruct((B, T, C), jnp.bfloat16),
        grid=(B, nt),
        in_specs=[
            pl.BlockSpec((None, tt, C), lambda b, i: (b, i, 0)),
            _const_spec(p["ln_g"].shape), _const_spec(p["ln_b"].shape),
        ],
        out_specs=pl.BlockSpec((None, tt, C), lambda b, i: (b, i, 0)),
        compiler_params=_cparams(("parallel", "parallel")),
    )(x, p["ln_g"], p["ln_b"])

    # Decoder, tiled over (T, V); pad large non-divisible vocabs to 128 lanes.
    V = p["w_dec"].shape[1]
    w_dec, b_dec = p["w_dec"], p["b_dec"]
    Vp = V
    tv = _pick_tile(V, (512, 256, 128))
    if tv == V and V > 512:
        Vp = -(-V // 128) * 128
        w_dec = jnp.pad(w_dec, ((0, 0), (0, Vp - V)))
        b_dec = jnp.pad(b_dec, ((0, 0), (0, Vp - V)))
        tv = _pick_tile(Vp, (512, 256, 128))
    nv = Vp // tv

    logits = pl.pallas_call(
        _decoder_kernel,
        out_shape=jax.ShapeDtypeStruct((B, T, Vp), jnp.float32),
        grid=(B, nt, nv),
        in_specs=[
            pl.BlockSpec((None, tt, C), lambda b, i, j: (b, i, 0)),
            pl.BlockSpec((C, tv), lambda b, i, j: (0, j)),
            pl.BlockSpec((1, tv), lambda b, i, j: (0, j)),
        ],
        out_specs=pl.BlockSpec((None, tt, tv), lambda b, i, j: (b, i, j)),
        compiler_params=_cparams(("parallel", "parallel", "parallel")),
    )(xn, w_dec, b_dec)

    return logits[..., :V] if Vp != V else logits


def transformer_forward(tokens, params, context_size, n_head):
    """tokens: int32 (B, T).  Returns logits (B, T, vocab) f32."""
    if tokens.shape[1] > context_size:
        tokens = tokens[:, -context_size:]
    B, T = tokens.shape
    # Embedding gathers are glue (plain JAX); residual stream carried in bf16.
    tok_emb = jnp.take(params["wte"], tokens, axis=0)          # (B, T, C)
    pos_emb = params["wpe"][:T][None, :, :]                    # (1, T, C)
    x = (tok_emb + pos_emb).astype(jnp.bfloat16)               # dropout = identity (eval)
    for blk in params["blocks"]:
        x = block_forward(x, blk, n_head)
    return head_forward(x, params["head"])


# ---------------------------------------------------------------------------
# Deterministic parameter init (weights bf16, biases / LN params f32)
# ---------------------------------------------------------------------------
def init_params(key, vocab_size, context_size, n_embd, n_layer):
    def nrm(k, shape, dtype=jnp.float32, scale=0.02):
        return (scale * jax.random.normal(k, shape)).astype(dtype)

    keys = jax.random.split(key, 2 + n_layer + 1)
    params = {
        "wte": nrm(keys[0], (vocab_size, n_embd)),
        "wpe": nrm(keys[1], (context_size, n_embd)),
        "blocks": [],
    }
    C, H = n_embd, 4 * n_embd
    for i in range(n_layer):
        bk = jax.random.split(keys[2 + i], 8)
        params["blocks"].append({
            "ln1_g": jnp.ones((1, C), jnp.float32),
            "ln1_b": jnp.zeros((1, C), jnp.float32),
            "w_q": nrm(bk[0], (C, C), jnp.bfloat16),        # first C cols of qkv
            "b_q": nrm(bk[1], (1, C)),
            "w_kv": nrm(bk[2], (C, 2 * C), jnp.bfloat16),   # remaining 2C cols
            "b_kv": nrm(bk[3], (1, 2 * C)),
            "ln2_g": jnp.ones((1, C), jnp.float32),
            "ln2_b": jnp.zeros((1, C), jnp.float32),
            "w1": nrm(bk[4], (C, H), jnp.bfloat16),
            "b1": nrm(bk[5], (1, H)),
            "w2": nrm(bk[6], (H, C), jnp.bfloat16),
            "b2": nrm(bk[7], (1, C)),
        })
    hk = jax.random.split(keys[-1], 2)
    params["head"] = {
        "ln_g": jnp.ones((1, C), jnp.float32),
        "ln_b": jnp.zeros((1, C), jnp.float32),
        "w_dec": nrm(hk[0], (C, vocab_size), jnp.bfloat16),
        "b_dec": nrm(hk[1], (1, vocab_size)),
    }
    return params


# ---------------------------------------------------------------------------
if __name__ == "__main__":
    vocab_size = 32
    context_size = 16
    n_embd = 32
    n_head = 4
    n_layer = 2
    B, T = 2, 8

    key = jax.random.PRNGKey(0)
    pkey, tkey = jax.random.split(key)
    params = init_params(pkey, vocab_size, context_size, n_embd, n_layer)
    tokens = jax.random.randint(tkey, (B, T), 0, vocab_size, dtype=jnp.int32)

    logits = transformer_forward(tokens, params, context_size, n_head)
    jax.block_until_ready(logits)
    assert logits.shape == (B, T, vocab_size), logits.shape
    assert logits.dtype == jnp.float32
    print("KERNEL_OK")
</pallas_src>

<mosaic_0001>
module attributes {stable_mosaic.version = 11 : i64} {
  func.func @k(%arg0: i32, %arg1: memref<8x128xf32, #tpu.memory_space<vmem>>, %arg2: memref<8x128xf32, #tpu.memory_space<vmem>>) attributes {dimension_semantics = [#tpu.dimension_semantics<arbitrary>], iteration_bounds = array<i64: 2>, scalar_prefetch = 0 : i64, scratch_operands = 0 : i64, tpu.core_type = #tpu.core_type<tc>, window_params = [{pipeline_mode = #tpu.pipeline_mode<synchronous>, transform_indices = @transform_0, window_bounds = array<i64: 8, 128>}, {transform_indices = @transform_1, window_bounds = array<i64: 8, 128>}]} {
    %c0 = arith.constant 0 : index
    %c0_0 = arith.constant 0 : index
    %0 = vector.load %arg1[%c0, %c0_0] : memref<8x128xf32, #tpu.memory_space<vmem>>, vector<8x128xf32>
    %cst = arith.constant 2.000000e+00 : f32
    %1 = vector.broadcast %cst : f32 to vector<8x128xf32>
    %2 = arith.mulf %0, %1 : vector<8x128xf32>
    %c0_1 = arith.constant 0 : index
    %c0_2 = arith.constant 0 : index
    %3 = vector.load %arg2[%c0_1, %c0_2] : memref<8x128xf32, #tpu.memory_space<vmem>>, vector<8x128xf32>
    tpu.vector_store %arg2[%c0_1, %c0_2], %2 {strides = array<i32>} : memref<8x128xf32, #tpu.memory_space<vmem>>, vector<8x128xf32>,
    return
  }
  func.func @transform_0(%arg0: i32) -> (i32, i32) {
    %c0_i32 = arith.constant 0 : i32
    %c0_i32_0 = arith.constant 0 : i32
    %c0_i32_1 = arith.constant 0 : i32
    return %c0_i32, %c0_i32_0 : i32, i32
  }
  func.func @transform_1(%arg0: i32) -> (i32, i32) {
    %c0_i32 = arith.constant 0 : i32
    %c0_i32_0 = arith.constant 0 : i32
    return %arg0, %c0_i32 : i32, i32
  }
}

module attributes {stable_mosaic.version = 11 : i64} {
  func.func @_kv_kernel(%arg0: i32, %arg1: i32, %arg2: memref<1x8x32xbf16, #tpu.memory_space<vmem>>, %arg3: memref<1x32xf32, #tpu.memory_space<vmem>>, %arg4: memref<1x32xf32, #tpu.memory_space<vmem>>, %arg5: memref<32x64xbf16, #tpu.memory_space<vmem>>, %arg6: memref<1x64xf32, #tpu.memory_space<vmem>>, %arg7: memref<1x8x32xbf16, #tpu.memory_space<vmem>>, %arg8: memref<1x8x32xbf16, #tpu.memory_space<vmem>>) attributes {dimension_semantics = [#tpu.dimension_semantics<parallel>, #tpu.dimension_semantics<parallel>], iteration_bounds = array<i64: 2, 1>, scalar_prefetch = 0 : i64, scratch_operands = 0 : i64, tpu.core_type = #tpu.core_type<tc>, window_params = [{transform_indices = @transform_0, window_bounds = array<i64: 1, 8, 32>}, {pipeline_mode = #tpu.pipeline_mode<synchronous>, transform_indices = @transform_1, window_bounds = array<i64: 1, 32>}, {pipeline_mode = #tpu.pipeline_mode<synchronous>, transform_indices = @transform_2, window_bounds = array<i64: 1, 32>}, {pipeline_mode = #tpu.pipeline_mode<synchronous>, transform_indices = @transform_3, window_bounds = array<i64: 32, 64>}, {pipeline_mode = #tpu.pipeline_mode<synchronous>, transform_indices = @transform_4, window_bounds = array<i64: 1, 64>}, {transform_indices = @transform_5, window_bounds = array<i64: 1, 8, 32>}, {transform_indices = @transform_6, window_bounds = array<i64: 1, 8, 32>}]} {
    %c0 = arith.constant 0 : index
    %c0_0 = arith.constant 0 : index
    %c0_1 = arith.constant 0 : index
    %0 = vector.load %arg2[%c0, %c0_0, %c0_1] : memref<1x8x32xbf16, #tpu.memory_space<vmem>>, vector<1x8x32xbf16>
    %1 = vector.shape_cast %0 : vector<1x8x32xbf16> to vector<8x32xbf16>
    %2 = arith.extf %1 : vector<8x32xbf16> to vector<8x32xf32>
    %c0_2 = arith.constant 0 : index
    %c0_3 = arith.constant 0 : index
    %3 = vector.load %arg3[%c0_2, %c0_3] : memref<1x32xf32, #tpu.memory_space<vmem>>, vector<1x32xf32>
    %c0_4 = arith.constant 0 : index
    %c0_5 = arith.constant 0 : index
    %4 = vector.load %arg4[%c0_4, %c0_5] : memref<1x32xf32, #tpu.memory_space<vmem>>, vector<1x32xf32>
    %cst = arith.constant dense<0.000000e+00> : vector<8xf32>
    %5 = vector.multi_reduction <add>, %2, %cst [1] : vector<8x32xf32> to vector<8xf32>
    %6 = vector.shape_cast %5 : vector<8xf32> to vector<8x1xf32>
    %cst_6 = arith.constant 3.200000e+01 : f32
    %7 = vector.broadcast %cst_6 : f32 to vector<8x1xf32>
    %8 = arith.divf %6, %7 : vector<8x1xf32>
    %9 = vector.broadcast %8 : vector<8x1xf32> to vector<8x32xf32>
    %10 = arith.subf %2, %9 : vector<8x32xf32>
    %11 = arith.mulf %10, %10 : vector<8x32xf32>
    %cst_7 = arith.constant dense<0.000000e+00> : vector<8xf32>
    %12 = vector.multi_reduction <add>, %11, %cst_7 [1] : vector<8x32xf32> to vector<8xf32>
    %13 = vector.shape_cast %12 : vector<8xf32> to vector<8x1xf32>
    %cst_8 = arith.constant 3.200000e+01 : f32
    %14 = vector.broadcast %cst_8 : f32 to vector<8x1xf32>
    %15 = arith.divf %13, %14 : vector<8x1xf32>
    %16 = vector.broadcast %8 : vector<8x1xf32> to vector<8x32xf32>
    %17 = arith.subf %2, %16 : vector<8x32xf32>
    %cst_9 = arith.constant 9.99999974E-6 : f32
    %18 = vector.broadcast %cst_9 : f32 to vector<8x1xf32>
    %19 = arith.addf %15, %18 : vector<8x1xf32>
    %20 = math.rsqrt %19 : vector<8x1xf32>
    %21 = vector.broadcast %20 : vector<8x1xf32> to vector<8x32xf32>
    %22 = arith.mulf %17, %21 : vector<8x32xf32>
    %23 = vector.broadcast %3 : vector<1x32xf32> to vector<8x32xf32>
    %24 = arith.mulf %22, %23 : vector<8x32xf32>
    %25 = vector.broadcast %4 : vector<1x32xf32> to vector<8x32xf32>
    %26 = arith.addf %24, %25 : vector<8x32xf32>
    %27 = arith.truncf %26 : vector<8x32xf32> to vector<8x32xbf16>
    %c0_10 = arith.constant 0 : index
    %c0_11 = arith.constant 0 : index
    %28 = vector.load %arg5[%c0_10, %c0_11] : memref<32x64xbf16, #tpu.memory_space<vmem>>, vector<32x64xbf16>
    %cst_12 = arith.constant dense<0.000000e+00> : vector<8x64xf32>
    %29 = tpu.matmul %27, %28, %cst_12 {dimension_numbers = #tpu.dot_dimension_numbers<[1], [0], [0], [1], [0, 0, 1, 1], [], []>} : vector<8x32xbf16>, vector<32x64xbf16>, vector<8x64xf32> -> vector<8x64xf32>
    %c0_13 = arith.constant 0 : index
    %c0_14 = arith.constant 0 : index
    %30 = vector.load %arg6[%c0_13, %c0_14] : memref<1x64xf32, #tpu.memory_space<vmem>>, vector<1x64xf32>
    %31 = vector.broadcast %30 : vector<1x64xf32> to vector<8x64xf32>
    %32 = arith.addf %29, %31 : vector<8x64xf32>
    %33 = vector.extract_strided_slice %32 {offsets = [0, 0], sizes = [8, 32], strides = [1, 1]} : vector<8x64xf32> to vector<8x32xf32>
    %34 = arith.truncf %33 : vector<8x32xf32> to vector<8x32xbf16>
    %c0_15 = arith.constant 0 : index
    %c0_16 = arith.constant 0 : index
    %c0_17 = arith.constant 0 : index
    %35 = vector.load %arg7[%c0_15, %c0_16, %c0_17] : memref<1x8x32xbf16, #tpu.memory_space<vmem>>, vector<1x8x32xbf16>
    %36 = vector.shape_cast %35 : vector<1x8x32xbf16> to vector<8x32xbf16>
    %37 = vector.shape_cast %34 : vector<8x32xbf16> to vector<1x8x32xbf16>
    tpu.vector_store %arg7[%c0_15, %c0_16, %c0_17], %37 {strides = array<i32>} : memref<1x8x32xbf16, #tpu.memory_space<vmem>>, vector<1x8x32xbf16>,
    %38 = vector.extract_strided_slice %32 {offsets = [0, 32], sizes = [8, 32], strides = [1, 1]} : vector<8x64xf32> to vector<8x32xf32>
    %39 = arith.truncf %38 : vector<8x32xf32> to vector<8x32xbf16>
    %c0_18 = arith.constant 0 : index
    %c0_19 = arith.constant 0 : index
    %c0_20 = arith.constant 0 : index
    %40 = vector.load %arg8[%c0_18, %c0_19, %c0_20] : memref<1x8x32xbf16, #tpu.memory_space<vmem>>, vector<1x8x32xbf16>
    %41 = vector.shape_cast %40 : vector<1x8x32xbf16> to vector<8x32xbf16>
    %42 = vector.shape_cast %39 : vector<8x32xbf16> to vector<1x8x32xbf16>
    tpu.vector_store %arg8[%c0_18, %c0_19, %c0_20], %42 {strides = array<i32>} : memref<1x8x32xbf16, #tpu.memory_space<vmem>>, vector<1x8x32xbf16>,
    return
  }
  func.func @transform_0(%arg0: i32, %arg1: i32) -> (i32, i32, i32) {
    %c0_i32 = arith.constant 0 : i32
    %c0_i32_0 = arith.constant 0 : i32
    return %arg0, %arg1, %c0_i32 : i32, i32, i32
  }
  func.func @transform_1(%arg0: i32, %arg1: i32) -> (i32, i32) {
    %c0_i32 = arith.constant 0 : i32
    %c0_i32_0 = arith.constant 0 : i32
    %c0_i32_1 = arith.constant 0 : i32
    return %c0_i32, %c0_i32_0 : i32, i32
  }
  func.func @transform_2(%arg0: i32, %arg1: i32) -> (i32, i32) {
    %c0_i32 = arith.constant 0 : i32
    %c0_i32_0 = arith.constant 0 : i32
    %c0_i32_1 = arith.constant 0 : i32
    return %c0_i32, %c0_i32_0 : i32, i32
  }
  func.func @transform_3(%arg0: i32, %arg1: i32) -> (i32, i32) {
    %c0_i32 = arith.constant 0 : i32
    %c0_i32_0 = arith.constant 0 : i32
    %c0_i32_1 = arith.constant 0 : i32
    return %c0_i32, %c0_i32_0 : i32, i32
  }
  func.func @transform_4(%arg0: i32, %arg1: i32) -> (i32, i32) {
    %c0_i32 = arith.constant 0 : i32
    %c0_i32_0 = arith.constant 0 : i32
    %c0_i32_1 = arith.constant 0 : i32
    return %c0_i32, %c0_i32_0 : i32, i32
  }
  func.func @transform_5(%arg0: i32, %arg1: i32) -> (i32, i32, i32) {
    %c0_i32 = arith.constant 0 : i32
    %c0_i32_0 = arith.constant 0 : i32
    return %arg0, %arg1, %c0_i32 : i32, i32, i32
  }
  func.func @transform_6(%arg0: i32, %arg1: i32) -> (i32, i32, i32) {
    %c0_i32 = arith.constant 0 : i32
    %c0_i32_0 = arith.constant 0 : i32
    return %arg0, %arg1, %c0_i32 : i32, i32, i32
  }
}

</mosaic_0001>

<bundles_post_ra>
// kernel: tpu_custom_call.1
= control target key start
LH: loop header
LB: loop body
LE: loop exit
PB: predicated region body
PF: predicated region fallthrough
CT: control target
= control target key end

     0   :  { %6 = vsyncpa [#allocation3], 0  ;;  %s482_s0 = inlined_call_operand.hbm [shape: f32[8,128], index: 0, kind: input, shape index: {}]   ;;  %s483_s1 = inlined_call_operand.hbm [shape: f32[16,128], index: 1, kind: output, shape index: {}]  }
   0x1   :  { %7 = vsyncpa [#allocation4], 0 }
   0x2   :  { %9 = vsyncpa [#allocation4 + $0x1], 0  ;;  %s352_s6 = smov 0   ;;  %s354_s7 = smov 0  }
   0x3   :  { %s356_s8 = smov 0   ;;  %s358_s9 = smov 0  }
   0x4 LB: > { %s373_s10 = sadd.s32 4294967295, %s338_s9   ;;  %s184_s11 = sadd.s32 4294967294, %s338_s9   ;;  %s338_s9 = sphi %s358_s9, %s499_s9   ;;  %s334_s8 = sphi %s356_s8, %s498_s8   ;;  %s330_s7 = sphi %s354_s7, %s497_s7   ;;  %s326_s6 = sphi %s352_s6, %s496_s6  }
   0x5   : > { %s377_s12 = sadd.s32 1, %s338_s9   ;;  %s43_s13 = sadd.s32 1, %s334_s8 }
   0x6   : > { %s40_s14 = ssub.s32 %s338_s9, %s377_s12  ;;  %p53_p0 = scmp.ne.s32.totalorder %s334_s8, %s330_s7 }
   0x7   : > { %p41_p1 = scmp.eq.s32.totalorder %s40_s14, 0  ;;  %p54_p2 = scmp.eq.s32.totalorder %s373_s10, 1 }
   0x8   : > { %p59_p3 = scmp.ne.s32.totalorder %s330_s7, %s326_s6  ;;  %p60_p4 = scmp.eq.s32.totalorder %s184_s11, 1 }
   0x9   : > { %s388_s15 = scalar_select %p41_p1, %s334_s8, %s43_s13  }
   0xa   : > { %p390_p5 = por %p54_p2, %p53_p0  ;;  %p394_p6 = por %p60_p4, %p59_p3 }
   0xb   : > { %p185_p7 = scmp.ge.s32.totalorder %s338_s9, 1  ;;  %p67_p8 = scmp.lt.s32.totalorder %s338_s9, 3 }
   0xc   : > { %s487_s16 = scalar_select %p390_p5, 1, 0 }
   0xd   : > { %s488_s17 = scalar_select %p394_p6, 1, 0 }
   0xe   : > { %p484_p9 = scmp.eq.s32.totalorder %s373_s10, 0  ;;  %p401_p10 = pnand %p185_p7, %p67_p8 }
   0xf   : > { %s340_s19 = smov [#allocation2]   ;;  %s244_s24 = scalar_lea.hbm %s482_s0, 128 }
  0x10   : > { %s489_s18 = scalar_select %p401_p10, 1, 0 }
  0x11   : > { %s80_s20 = sshll.u32 %s340_s19, 4  ;;  %p200_p11 = pneg %p401_p10  ;;  %s81_s20 = int_to_ptr.vmem [resolvable:$true] %s80_s20 }
  0x12   : > { %p245_p13 = scmp.ne.s32.totalorder %s482_s0, %s244_s24  ;;  %p251_p3 = scmp.lt.u32.totalorder %s244_s24, %s482_s0 }
  0x13   : > { %p409_p12 = pnand %p484_p9, %p200_p11 }
  0x15   : > { %p246_p0 = pneg %p409_p12 }
  0x17   : > { %p247_p1 = pnand %p246_p0, %p245_p13 }
  0x19   : > { %p248_p2 = pneg %p247_p1 }
  0x1b   : > { %p253_p4 = pnand %p251_p3, %p248_p2 }
  0x1d   : > { %256 = shalt.err (!%p253_p4)
}
  0x1e   : > { %s257_s29 = scalar_lea.vmem %s81_s20, 128  ;;  %p265_p9 = scmp.lt.s32.totalorder %s81_s20, %s81_s20 }
  0x1f   : > { %p258_p7 = scmp.ne.s32.totalorder %s81_s20, %s257_s29  ;;  %p266_p6 = scmp.lt.s32.totalorder %s257_s29, %s257_s29 }
  0x21   : > { %p260_p8 = pnand %p258_p7, %p246_p0  ;;  %p267_p5 = por %p266_p6, %p265_p9 }
  0x23   : > { %p261_p11 = pneg %p260_p8 }
  0x25   : > { %p268_p10 = pnand %p267_p5, %p261_p11 }
  0x27   : > { %271 = shalt.err (!%p268_p10)
}
  0x28   : > { %203 = dma.hbm_to_vmem [thread:$0]  (!%p409_p12), %s482_s0, 128, %s81_s20, [#allocation3]  }
  0x29   : > { %p491_p13 = scmp.ne.s32.totalorder %s489_s18, 0 }
  0x2a   : > { %p492_p1 = scmp.eq.s32.totalorder (!%p491_p13), %s373_s10, 0 }
  0x2b   : > { %93 = sbr.rel (%p491_p13) target bundleno = 77 (0x4d), region = 24 }
  0x32   : > { %317 = dma.done.wait (%p492_p1), [#allocation3], 128   ;;  %p493_p0 = pmov %p492_p1 }
  0x33   : > { %s105_s3 = sand.u32 1, %s330_s7   ;;  %s191_s13 = sshll.u32 %s373_s10, 7  ;;  %v108_v0 = vld [vmem:[#allocation2] sm:$0xff] }
  0x34   : > { %319 = vsyncadd (%p493_p0), [#allocation3], 4294967168  ;;  %s189_s4 = sshll.u32 %s105_s3, 3  ;;  %v109_v1 = vmul.f32 2.0, %v108_v0  ;;  %s442_s19 = scalar_lea.hbm %s483_s1, %s191_s13 }
  0x35   : > { %s107_s5 = scalar_lea.vmem [#allocation5], %s189_s4  ;;  %s112_s20 = scalar_lea.sflag [#allocation4], %s105_s3 }
  0x36   : > { %s125_s11 = sshll.u32 %s107_s5, 4  ;;  %110 = vst [vmem:[%s107_s5] sm:$0xff] %v109_v1  ;;  %p494_p6 = scmp.ne.s32.totalorder %s487_s16, 0  ;;  %s437_s11 = int_to_ptr.vmem [resolvable:$true] %s125_s11 }
  0x37   : > { %s272_s21 = scalar_lea.vmem %s437_s11, 128  ;;  %s341_s10 = smov [#allocation5]  }
  0x38   : > { %p273_p5 = scmp.ne.s32.totalorder %s437_s11, %s272_s21  ;;  %s276_s22 = sshll.u32 %s341_s10, 4  ;;  %s277_s22 = int_to_ptr.vmem [resolvable:$false] %s276_s22 }
  0x39   : > { %s278_s23 = scalar_lea.vmem %s277_s22, 256  ;;  %p279_p12 = scmp.lt.s32.totalorder %s437_s11, %s277_s22 }
  0x3a   : > { %p274_p9 = pnand %p273_p5, %p494_p6  ;;  %p280_p2 = scmp.lt.s32.totalorder %s278_s23, %s272_s21 }
  0x3c   : > { %p275_p10 = pneg %p274_p9  ;;  %p281_p3 = por %p280_p2, %p279_p12 }
  0x3e   : > { %p282_p4 = pnand %p281_p3, %p275_p10 }
  0x40   : > { %285 = shalt.err (!%p282_p4)
}
  0x41   : > { %s286_s24 = scalar_lea.hbm %s442_s19, 128  ;;  %s290_s27 = scalar_lea.hbm %s483_s1, 256 }
  0x42   : > { %p287_p7 = scmp.ne.s32.totalorder %s442_s19, %s286_s24  ;;  %p291_p13 = scmp.lt.u32.totalorder %s442_s19, %s483_s1 }
  0x43   : > { %p292_p1 = scmp.lt.u32.totalorder %s290_s27, %s286_s24  ;;  %p294_p5 = scmp.lt.u32.totalorder %s286_s24, %s442_s19 }
  0x44   : > { %p288_p8 = pnand %p287_p7, %p494_p6 }
  0x45   : > { %p293_p0 = por %p292_p1, %p291_p13 }
  0x46   : > { %p289_p11 = pneg %p288_p8 }
  0x47   : > { %p295_p9 = por %p294_p5, %p293_p0 }
  0x49   : > { %p296_p10 = pnand %p295_p9, %p289_p11 }
  0x4b   : > { %299 = shalt.err (!%p296_p10)
}
  0x4c   : > { %198 = dma.vmem_to_hbm [thread:$0]  (%p494_p6), %s437_s11, 128, %s442_s19, %s112_s20  }
  0x4d PF: > { %p210_p12 = scmp.ge.s32.totalorder %s338_s9, 2  ;;  %s137_s30 = sand.u32 1, %s326_s6  }
  0x4e   : > { %p495_p2 = scmp.ne.s32.totalorder %s488_s17, 0  ;;  %s138_s2 = scalar_lea.sflag [#allocation4], %s137_s30 }
  0x50   : > { %p205_p3 = pnand %p210_p12, %p495_p2 }
  0x52   : > { %321 = dma.done.wait (!%p205_p3), %s138_s2, 128  }
  0x53   : > { %323 = vsyncadd (!%p205_p3), %s138_s2, 4294967168  ;;  %p12_p4 = scmp.ge.s32.totalorder %s377_s12, 4   ;;  %s496_s6 = smov %s330_s7 }
  0x54   : > { %s497_s7 = smov %s334_s8  ;;  %s498_s8 = smov %s388_s15 }
  0x55   : > { %s499_s9 = smov %s377_s12  ;;  %14 = sbr.rel (!%p12_p4) target bundleno = 4 (0x4), region = 61 }
  0x5c   :  { %143 = vsyncpa [#allocation3], 1 }
  0x5d   :  { %145 = vsyncpa [#allocation3 + $0x1], 1 }
  0x5e   :  { %146 = vsyncpa [#allocation4], 1 }
  0x5f   :  { %148 = vsyncpa [#allocation4 + $0x1], 1 }

// kernel: tpu_custom_call.1
= control target key start
LH: loop header
LB: loop body
LE: loop exit
PB: predicated region body
PF: predicated region fallthrough
CT: control target
= control target key end

     0   :  { %s1192_s0 = inlined_call_operand.hbm [shape: bf16[2,8,32], index: 0, kind: input, shape index: {}]   ;;  %s1193_s1 = inlined_call_operand.vmem [shape: f32[1,32], index: 1, kind: input, shape index: {}]   ;;  %s1194_s2 = inlined_call_operand.vmem [shape: f32[1,32], index: 2, kind: input, shape index: {}]   ;;  %s1195_s3 = inlined_call_operand.hbm [shape: bf16[32,64], index: 3, kind: input, shape index: {}]   ;;  %s1196_s4 = inlined_call_operand.vmem [shape: f32[1,64], index: 4, kind: input, shape index: {}]   ;;  %s1197_s5 = inlined_call_operand.hbm [shape: bf16[2,8,32], index: 5, kind: output, shape index: {0}]   ;;  %s1198_s6 = inlined_call_operand.hbm [shape: bf16[2,8,32], index: 6, kind: output, shape index: {1}]  }
   0x1   :  { %1203 = sst [smem:[#allocation14_spill]] %s1195_s3 }
   0x2   :  { %12 = vsyncpa [#allocation3], 0 }
   0x3   :  { %14 = vsyncpa [#allocation3 + $0x1], 0 }
   0x4   :  { %15 = vsyncpa [#allocation6], 0 }
   0x5   :  { %16 = vsyncpa [#allocation4], 0 }
   0x6   :  { %18 = vsyncpa [#allocation4 + $0x1], 0 }
   0x7   :  { %19 = vsyncpa [#allocation9], 0 }
   0x8   :  { %21 = vsyncpa [#allocation9 + $0x1], 0  ;;  %s926_s21 = smov 0   ;;  %s928_s22 = smov 0  }
   0x9   :  { %s930_s23 = smov 0   ;;  %s932_s24 = smov 0  }
   0xa   :  { %s934_s25 = smov 0   ;;  %s936_s26 = smov 0  }
   0xb LB: > { %s580_s27 = sadd.s32 4294967295, %s880_s26   ;;  %s581_s28 = sadd.s32 4294967294, %s880_s26   ;;  %s880_s26 = sphi %s936_s26, %s27_s26   ;;  %s876_s25 = sphi %s934_s25, %s1224_s25   ;;  %s872_s24 = sphi %s932_s24, %s1223_s24   ;;  %s868_s23 = sphi %s930_s23, %s1222_s23   ;;  %s864_s22 = sphi %s928_s22, %s1221_s22   ;;  %s860_s21 = sphi %s926_s21, %s1220_s21  }
   0xc   : > { %p61_p0 = scmp.ne.s32.totalorder %s864_s22, %s860_s21  ;;  %p960_p1 = scmp.eq.s32.totalorder %s580_s27, 0 }
   0xd   : > { %p964_p2 = scmp.eq.s32.totalorder %s580_s27, 1  ;;  %p177_p3 = scmp.eq.s32.totalorder %s581_s28, 1 }
   0xe   : > { %s1204_s29 = scalar_select %p960_p1, 1, 0 }
   0xf   : > { %s1205_s30 = scalar_select %p964_p2, 1, 0 }
  0x10   : > { %p970_p4 = por %p960_p1, %p61_p0  ;;  %p582_p5 = scmp.ge.s32.totalorder %s880_s26, 1 }
  0x11   : > { %p975_p6 = por %p177_p3, %p61_p0  ;;  %p212_p7 = scmp.lt.s32.totalorder %s880_s26, 3 }
  0x12   : > { %s1206_s7 = scalar_select %p970_p4, 1, 0 }
  0x13   : > { %s1207_s8 = scalar_select %p975_p6, 1, 0 }
  0x14   : > { %p980_p8 = pnand %p582_p5, %p212_p7  ;;  %s882_s10 = smov [#allocation5]  }
  0x15   : > { %s230_s11 = sshll.u32 %s882_s10, 4  ;;  %s39_s13 = sadd.s32 1, %s876_s25  ;;  %s231_s11 = int_to_ptr.vmem [resolvable:$true] %s230_s11 }
  0x16   : > { %s1208_s9 = scalar_select %p980_p8, 1, 0 }
  0x17   : > { %p627_p9 = pneg %p980_p8  ;;  %s1210_s3 = sld [smem:[#allocation14_spill]] }
  0x19   : > { %p989_p11 = pnand %p627_p9, %p960_p1 }
  0x1b   : > { %p706_p13 = pneg %p989_p11 }
  0x1d   : > { %s704_s16 = scalar_lea.hbm %s1210_s3, 256 }
  0x1e   : > { %p705_p12 = scmp.ne.s32.totalorder %s1210_s3, %s704_s16  ;;  %p711_p5 = scmp.lt.u32.totalorder %s704_s16, %s1210_s3 }
  0x20   : > { %p707_p0 = pnand %p706_p13, %p705_p12 }
  0x22   : > { %p708_p3 = pneg %p707_p0 }
  0x24   : > { %p713_p7 = pnand %p711_p5, %p708_p3 }
  0x26   : > { %716 = shalt.err (!%p713_p7)
}
  0x27   : > { %s717_s27 = scalar_lea.vmem %s231_s11, 256  ;;  %p725_p1 = scmp.lt.s32.totalorder %s231_s11, %s231_s11 }
  0x28   : > { %p718_p9 = scmp.ne.s32.totalorder %s231_s11, %s717_s27  ;;  %p726_p4 = scmp.lt.s32.totalorder %s717_s27, %s717_s27 }
  0x2a   : > { %p720_p10 = pnand %p718_p9, %p706_p13  ;;  %p727_p8 = por %p726_p4, %p725_p1 }
  0x2c   : > { %p721_p6 = pneg %p720_p10 }
  0x2e   : > { %p728_p2 = pnand %p727_p8, %p721_p6 }
  0x30   : > { %731 = shalt.err (!%p728_p2)
}
  0x31   : > { %s883_s28 = smov 64   ;;  %s884_s10 = smov 4  }
  0x32   : > { %630 = dma.hbm_to_vmem [thread:$0]  (!%p989_p11), %s1210_s3, 256, %s231_s11, [#allocation6], %s883_s28, %s883_s28, %s884_s10  }
  0x33   : > { %p41_p1 = scmp.ge.s32.totalorder %s39_s13, 2  ;;  %s48_s16 = sadd.s32 1, %s868_s23 }
  0x34   : > { %p55_p2 = scmp.ne.s32.totalorder %s868_s23, %s864_s22  ;;  %p56_p4 = scmp.eq.s32.totalorder %s880_s26, 0 }
  0x35   : > { %s1226_s13 = smov (%p41_p1, %s39_s13), 0  ;;  %p1212_p8 = scmp.ne.s32.totalorder %s1205_s30, 0 }
  0x36   : > { %p1016_p6 = por %p56_p4, %p55_p2  ;;  %s43_s12 = ssub.s32 %s876_s25, %s1226_s13 }
  0x37   : > { %p1022_p10 = por %p1212_p8, %p55_p2  ;;  %p643_p12 = scmp.lt.s32.totalorder %s880_s26, 2 }
  0x38   : > { %p46_p11 = scmp.eq.s32.totalorder %s43_s12, 0  ;;  %s247_s11 = sand.u32 1, %s868_s23  }
  0x39   : > { %s585_s19 = sshll.u32 %s247_s11, 2  ;;  %s586_s27 = sshll.u32 %s876_s25, 6 }
  0x3a   : > { %s1031_s20 = scalar_select %p46_p11, %s868_s23, %s48_s16  }
  0x3b   : > { %s1037_s14 = scalar_lea.hbm %s1192_s0, %s586_s27  ;;  %s251_s30 = scalar_lea.vmem [#allocation2], %s585_s19 }
  0x3c   : > { %s259_s15 = sshll.u32 %s251_s30, 4  ;;  %p1043_p13 = pnand %p643_p12, %p1016_p6  ;;  %s1039_s15 = int_to_ptr.vmem [resolvable:$true] %s259_s15 }
  0x3d   : > { %s248_s16 = scalar_lea.sflag [#allocation3], %s247_s11  ;;  %s732_s3 = scalar_lea.hbm %s1037_s14, 64 }
  0x3e   : > { %p733_p0 = scmp.ne.s32.totalorder %s1037_s14, %s732_s3  ;;  %p734_p3 = pneg %p1043_p13 }
  0x3f   : > { %s737_s28 = scalar_lea.hbm %s1192_s0, 128  ;;  %p738_p9 = scmp.lt.u32.totalorder %s1037_s14, %s1192_s0 }
  0x40   : > { %p735_p5 = pnand %p734_p3, %p733_p0  ;;  %p739_p1 = scmp.lt.u32.totalorder %s737_s28, %s732_s3 }
  0x41   : > { %p741_p4 = scmp.lt.u32.totalorder %s732_s3, %s1037_s14 }
  0x42   : > { %p736_p7 = pneg %p735_p5  ;;  %p740_p2 = por %p739_p1, %p738_p9 }
  0x44   : > { %p742_p6 = por %p741_p4, %p740_p2 }
  0x46   : > { %p743_p8 = pnand %p742_p6, %p736_p7 }
  0x48   : > { %746 = shalt.err (!%p743_p8)
}
  0x49   : > { %s747_s11 = scalar_lea.vmem %s1039_s15, 64  ;;  %s885_s30 = smov [#allocation2]  }
  0x4a   : > { %p748_p12 = scmp.ne.s32.totalorder %s1039_s15, %s747_s11  ;;  %s752_s19 = sshll.u32 %s885_s30, 4  ;;  %s753_s19 = int_to_ptr.vmem [resolvable:$false] %s752_s19 }
  0x4b   : > { %s754_s27 = scalar_lea.vmem %s753_s19, 128  ;;  %p755_p5 = scmp.lt.s32.totalorder %s1039_s15, %s753_s19 }
  0x4c   : > { %p750_p11 = pnand %p748_p12, %p734_p3  ;;  %p756_p9 = scmp.lt.s32.totalorder %s754_s27, %s747_s11 }
  0x4e   : > { %p751_p0 = pneg %p750_p11  ;;  %p757_p1 = por %p756_p9, %p755_p5 }
  0x50   : > { %p758_p2 = pnand %p757_p1, %p751_p0 }
  0x52   : > { %761 = shalt.err (!%p758_p2)
}
  0x53   : > { %634 = dma.hbm_to_vmem [thread:$0]  (!%p1043_p13), %s1037_s14, 64, %s1039_s15, %s248_s16  }
  0x54   : > { %p1215_p7 = scmp.ne.s32.totalorder %s1208_s9, 0 }
  0x55   : > { %s1075_s3 = sand.u32 (!%p1215_p7), 1, %s864_s22   ;;  %p1216_p3 = scmp.ne.s32.totalorder (!%p1215_p7), %s1206_s7, 0 }
  0x56   : > { %268 = sbr.rel (%p1215_p7) target bundleno = 760 (0x2f8), region = 40  ;;  %s1078_s28 = sshll.u32 (!%p1215_p7), %s1075_s3, 2 }
  0x57   : > { %s271_s17 = scalar_lea.sflag (!%p1215_p7), [#allocation3], %s1075_s3  ;;  %s274_s10 = scalar_lea.vmem (!%p1215_p7), [#allocation2], %s1078_s28 }
  0x5d   : > { %843 = dma.done.wait (%p1216_p3), %s271_s17, 64  }
  0x5e   : > { %845 = vsyncadd (%p1216_p3), %s271_s17, 4294967232  ;;  %p1217_p13 = scmp.ne.s32.totalorder %s1204_s29, 0 }
  0x60   : > { %847 = dma.done.wait (%p1217_p13), [#allocation6], 256  }
  0x61   : > { %849 = vsyncadd (%p1217_p13), [#allocation6], 4294967040  ;;  %vm317_vm0 = vcmask 261120   ;;  %v313_v0 = vld [vmem:[%s274_s10] sm:$0xf]  ;;  %v700_v8 = vld [vmem:[#allocation5] sm:$0xff]  }
  0x62   : > { %v314_v1 = vunpack.c.l.bf16 %v313_v0  ;;  %v886_v9 = vmov 0.0   ;;  %v701_v10 = vld [vmem:[#allocation5 + $0x8] sm:$0xff]   ;;  %vm887_vm1 = vmmov 0   ;;  %v592_v15 = vld [vmem:[%s1193_s1] ss:$0 sm:$0xff]  ;;  %s601_s16 = sshll.u32 %s872_s24, 6 }
  0x63   : > { %609 = vmatprep.subr.bf16.mxu0 %v886_v9  ;;  %613 = vmatprep.mubr.msk.bf16.mxu0 %vm887_vm1, %v886_v9  ;;  %v593_v17 = vld [vmem:[%s1194_s2] ss:$0 sm:$0xff]  ;;  %s304_s11 = scalar_lea.vmem [#allocation7], %s1078_s28  ;;  %vm414_vm2 = vcmask 257024   ;;  %s1109_s17 = scalar_lea.hbm %s1197_s5, %s601_s16 }
  0x64   : > { %v318_v2 = vsel %vm317_vm0, %v314_v1, 0.0  ;;  %610 = vmatpush3.bf16.msra.mxu0 %v700_v8  ;;  %v594_v21 = vld [vmem:[%s1196_s4] ss:$0 sm:$0xff]  ;;  %s443_s30 = sshll.u32 %s304_s11, 4  ;;  %s888_s10 = smov 96   ;;  %s1111_s30 = int_to_ptr.vmem [resolvable:$true] %s443_s30 }
  0x65   : > { %319 = vadd.xlane.f32.xlu0 %v318_v2  ;;  %611 = vmatprep.subr.bf16.mxu0 %v886_v9  ;;  %s424_s29 = scalar_lea.sflag [#allocation4], %s1075_s3  ;;  %s762_s7 = scalar_lea.vmem %s1111_s30, 64 }
  0x66   : > { %p763_p4 = scmp.ne.s32.totalorder %s1111_s30, %s762_s7  ;;  %s889_s9 = smov [#allocation7]  }
  0x67   : > { %s766_s14 = sshll.u32 %s889_s9, 4  ;;  %s767_s14 = int_to_ptr.vmem [resolvable:$false] %s766_s14 }
  0x68   : > { %612 = vmatpush3.bf16.msra.mxu0 %v701_v10  ;;  %p764_p6 = pnand %p763_p4, %p1022_p10  ;;  %s768_s15 = scalar_lea.vmem %s767_s14, 128 }
  0x69   : > { %p769_p12 = scmp.lt.s32.totalorder %s1111_s30, %s767_s14  ;;  %p770_p11 = scmp.lt.s32.totalorder %s768_s15, %s762_s7 }
  0x6a   : > { %p765_p8 = pneg %p764_p6 }
  0x6b   : > { %p771_p0 = por %p770_p11, %p769_p12 }
  0x6d   : > { %p772_p5 = pnand %p771_p0, %p765_p8 }
  0xf2   : > { %v320_v3 = vpop.xlane.xlu0 %319 }
  0xf3   : > { %v322_v4 = vmul.f32 0.03125, %v320_v3 }
  0xf5   : > { %v323_v5 = vsub.f32 %v314_v1, %v322_v4 }
  0xf7   : > { %v324_v6 = vmul.f32 %v323_v5, %v323_v5 }
  0xf9   : > { %v325_v7 = vsel %vm317_vm0, %v324_v6, 0.0 }
  0xfa   : > { %326 = vadd.xlane.f32.xlu0 %v325_v7 }
 0x187   : > { %v327_v11 = vpop.xlane.xlu0 %326 }
 0x188   : > { %v328_v12 = vmul.f32 0.03125, %v327_v11 }
 0x18a   : > { %v329_v13 = vadd.f32 1e-05, %v328_v12 }
 0x18c   : > { %702 = vrsqrt.f32 %v329_v13 }
 0x196   : > { %v703_v14 = vpop.eup %702 }
 0x197   : > { %v331_v16 = vmul.f32 %v703_v14, %v323_v5 }
 0x199   : > { %v338_v18 = vmul.f32 %v592_v15, %v331_v16 }
 0x19b   : > { %v345_v19 = vadd.f32 %v593_v17, %v338_v18 }
 0x19d   : > { %v346_v20 = vpack.c.bf16 %v345_v19, %v345_v19 }
 0x19f   : > { %614 = vmatmul.mubr.msk.bf16.vlgmr.msra.gmra.mrb[0].mxu0 %vm317_vm0, %v346_v20 }
 0x272   : > { %v407_v22 = vpop.f32.mrb[0].mxu0 }
 0x273   : > { %v408_v23 = vadd.f32 %v594_v21, %v407_v22  ;;  %v615_v24 = vpop.f32.mrb[1].mxu0 }
 0x274   : > { %v410_v25 = vpop.f32.mrb[2].mxu0 }
 0x275   : > { %v413_v26 = vpack.c.bf16 %v408_v23, %v408_v23  ;;  %v616_v27 = vpop.f32.mrb[3].mxu0 }
 0x277   : > { %419 = vrot.lane.b32.xlu1 %v413_v26, %s888_s10  ;;  %415 = vst.msk [vmem:[%s304_s11] sm:$0xf] %vm414_vm2, %v413_v26 }
 0x278   : > { %775 = shalt.err (!%p772_p5)
}
 0x279   : > { %s776_s12 = scalar_lea.hbm %s1109_s17, 64  ;;  %s780_s27 = scalar_lea.hbm %s1197_s5, 128 }
 0x27a   : > { %p777_p9 = scmp.ne.s32.totalorder %s1109_s17, %s776_s12  ;;  %p781_p7 = scmp.lt.u32.totalorder %s1109_s17, %s1197_s5 }
 0x27b   : > { %p782_p3 = scmp.lt.u32.totalorder %s780_s27, %s776_s12  ;;  %p784_p4 = scmp.lt.u32.totalorder %s776_s12, %s1109_s17 }
 0x27c   : > { %p778_p1 = pnand %p777_p9, %p1022_p10 }
 0x27d   : > { %p783_p13 = por %p782_p3, %p781_p7 }
 0x27e   : > { %p779_p2 = pneg %p778_p1 }
 0x27f   : > { %p785_p6 = por %p784_p4, %p783_p13 }
 0x281   : > { %p786_p8 = pnand %p785_p6, %p779_p2 }
 0x283   : > { %789 = shalt.err (!%p786_p8)
}
 0x284   : > { %623 = dma.vmem_to_hbm [thread:$0]  (%p1022_p10), %s1111_s30, 64, %s1109_s17, %s424_s29  }
 0x285   : > { %s311_s7 = scalar_lea.vmem [#allocation8], %s1078_s28  ;;  %s1142_s19 = scalar_lea.hbm %s1198_s6, %s601_s16 }
 0x286   : > { %s457_s14 = sshll.u32 %s311_s7, 4  ;;  %s429_s12 = scalar_lea.sflag [#allocation9], %s1075_s3  ;;  %s1144_s14 = int_to_ptr.vmem [resolvable:$true] %s457_s14 }
 0x287   : > { %s790_s27 = scalar_lea.vmem %s1144_s14, 64  ;;  %s890_s24 = smov [#allocation8]  }
 0x288   : > { %p791_p12 = scmp.ne.s32.totalorder %s1144_s14, %s790_s27  ;;  %s794_s28 = sshll.u32 %s890_s24, 4  ;;  %s795_s28 = int_to_ptr.vmem [resolvable:$false] %s794_s28 }
 0x289   : > { %s796_s30 = scalar_lea.vmem %s795_s28, 128  ;;  %p797_p5 = scmp.lt.s32.totalorder %s1144_s14, %s795_s28 }
 0x28a   : > { %p792_p11 = pnand %p791_p12, %p1022_p10  ;;  %p798_p9 = scmp.lt.s32.totalorder %s796_s30, %s790_s27 }
 0x28c   : > { %p793_p0 = pneg %p792_p11  ;;  %p799_p1 = por %p798_p9, %p797_p5 }
 0x28e   : > { %p800_p2 = pnand %p799_p1, %p793_p0 }
 0x2e9   : > { %v420_v28 = vpop.permute.xlu1 %419 }
 0x2ea   : > { %422 = vst.msk [vmem:[%s311_s7] sm:$0xf] %vm414_vm2, %v420_v28 }
 0x2eb   : > { %803 = shalt.err (!%p800_p2)
}
 0x2ec   : > { %s804_s3 = scalar_lea.hbm %s1142_s19, 64  ;;  %s808_s29 = scalar_lea.hbm %s1198_s6, 128 }
 0x2ed   : > { %p805_p7 = scmp.ne.s32.totalorder %s1142_s19, %s804_s3  ;;  %p809_p4 = scmp.lt.u32.totalorder %s1142_s19, %s1198_s6 }
 0x2ee   : > { %p810_p6 = scmp.lt.u32.totalorder %s808_s29, %s804_s3  ;;  %p812_p12 = scmp.lt.u32.totalorder %s804_s3, %s1142_s19 }
 0x2ef   : > { %p806_p3 = pnand %p805_p7, %p1022_p10 }
 0x2f0   : > { %p811_p8 = por %p810_p6, %p809_p4 }
 0x2f1   : > { %p807_p13 = pneg %p806_p3 }
 0x2f2   : > { %p813_p11 = por %p812_p12, %p811_p8 }
 0x2f4   : > { %p814_p0 = pnand %p813_p11, %p807_p13 }
 0x2f6   : > { %817 = shalt.err (!%p814_p0)
}
 0x2f7   : > { %624 = dma.vmem_to_hbm [thread:$0]  (%p1022_p10), %s1144_s14, 64, %s1142_s19, %s429_s12  }
 0x2f8 PF: > { %s469_s7 = sand.u32 1, %s860_s21   ;;  %p1218_p5 = scmp.ne.s32.totalorder %s1207_s8, 0 }
 0x2f9   : > { %p1219_p9 = scmp.ge.s32.totalorder %s880_s26, 2  ;;  %s470_s15 = scalar_lea.sflag [#allocation4], %s469_s7 }
 0x2fb   : > { %p636_p1 = pnand %p1219_p9, %p1218_p5 }
 0x2fd   : > { %851 = dma.done.wait (!%p636_p1), %s470_s15, 64  }
 0x2fe   : > { %853 = vsyncadd (!%p636_p1), %s470_s15, 4294967232  ;;  %s479_s11 = scalar_lea.sflag [#allocation9], %s469_s7 }
 0x2ff   : > { %855 = dma.done.wait (!%p636_p1), %s479_s11, 64  }
 0x300   : > { %857 = vsyncadd (!%p636_p1), %s479_s11, 4294967232  ;;  %s27_s26 = sadd.s32 1, %s880_s26   ;;  %s1220_s21 = smov %s864_s22 }
 0x301   : > { %p24_p2 = scmp.ge.s32.totalorder %s27_s26, 4   ;;  %s1221_s22 = smov %s868_s23 }
 0x302   : > { %s1222_s23 = smov %s1031_s20  ;;  %s1223_s24 = smov %s876_s25 }
 0x303   : > { %s1224_s25 = smov %s1226_s13  ;;  %26 = sbr.rel (!%p24_p2) target bundleno = 11 (0xb), region = 106 }
 0x30a   :  { %484 = vsyncpa [#allocation3], 1 }
 0x30b   :  { %486 = vsyncpa [#allocation3 + $0x1], 1 }
 0x30c   :  { %487 = vsyncpa [#allocation6], 1 }
 0x30d   :  { %488 = vsyncpa [#allocation4], 1 }
 0x30e   :  { %490 = vsyncpa [#allocation4 + $0x1], 1 }
 0x30f   :  { %491 = vsyncpa [#allocation9], 1 }
 0x310   :  { %493 = vsyncpa [#allocation9 + $0x1], 1 }

</bundles_post_ra>
